<compile_context>
chip_gen: v7x
topology: tpu7x:2x2x1
jax: 0.10.0
libtpu: 0.0.40
codegen_flags: <defaults>
</compile_context>

<pallas_src>
import functools

import jax
import jax.numpy as jnp
from jax import lax
from jax.experimental import pallas as pl
from jax.experimental.pallas import tpu as pltpu


def _round_up(x: int, m: int) -> int:
    return (x + m - 1) // m * m


def _im_tile_kernel(x_ref, ent_ref, psum_ref, *, batch, tile_b, tiles_per_core):
    # x_ref:    [tile_b, C]    logits tile (VMEM, auto-pipelined / double-buffered).
    # ent_ref:  [1, 1, 1]      per-core resident accumulator: sum of per-row entropy.
    # psum_ref: [1, 1, C]      per-core resident accumulator: sum of softmax probs.
    c = pl.program_id(0)  # megacore ("parallel") axis
    i = pl.program_id(1)  # batch-tile reduction ("arbitrary") axis

    @pl.when(i == 0)
    def _init():
        ent_ref[...] = jnp.zeros_like(ent_ref)
        psum_ref[...] = jnp.zeros_like(psum_ref)

    x = x_ref[...].astype(jnp.float32)  # [tile_b, C]

    # Logical row indices covered by this tile.  Rows >= batch are either pipeline
    # padding of the last partial tile (undefined contents) or a clamped surplus tile;
    # select them to 0 BEFORE exp/log so garbage (even NaN/Inf) cannot leak.
    row0 = (c * tiles_per_core + i) * tile_b
    rows = row0 + lax.broadcasted_iota(jnp.int32, (tile_b, 1), 0)
    valid = rows < batch  # bool [tile_b, 1]
    x = jnp.where(valid, x, 0.0)

    # Numerically stable softmax over the class (lane) axis.
    m = jnp.max(x, axis=1, keepdims=True)
    e = jnp.exp(x - m)
    s = jnp.sum(e, axis=1, keepdims=True)
    inv_s = pl.reciprocal(s, approx=False)  # per-row only -> exact result, negligible cost
    p = e * inv_s

    # Per-row entropy: -sum(p * log(p + 1e-5), dim=1), fused (no extra HBM temporaries).
    ent_rows = -jnp.sum(p * jnp.log(p + 1e-5), axis=1, keepdims=True)  # [tile_b, 1]

    validf = valid.astype(jnp.float32)
    ent_ref[...] += jnp.sum(ent_rows * validf).reshape(1, 1, 1)
    psum_ref[...] += jnp.sum(p * validf, axis=0).reshape(1, 1, -1)


def information_maximization(output: jax.Array, gent: bool = True, *, tile_b=None) -> jax.Array:
    """Pallas-TPU equivalent of InformationMaximization(gent)(output). Returns a scalar."""
    assert output.ndim == 2, "expected [batch, num_classes] logits"
    B, C = output.shape
    itemsize = jnp.dtype(output.dtype).itemsize

    # Auto-size the batch tile: biggest tile whose double-buffered input plus f32
    # temporaries stays comfortably inside scoped VMEM.  ~512-1024 rows already sits at
    # the HBM-roofline knee, so cap at 1024.
    c_phys = _round_up(C, 128)  # physical lane footprint of one row in VMEM
    if tile_b is None:
        budget = 2 * 1024 * 1024  # per pipeline buffer, conservative f32 accounting
        tile_b = max(8, min(1024, (budget // (c_phys * 4)) // 8 * 8))
    tile_b = max(8, _round_up(int(tile_b), 8))
    tile_b = min(tile_b, _round_up(B, 8))

    total_tiles = pl.cdiv(B, tile_b)
    ncores = 2 if total_tiles >= 2 else 1  # megacore split (v7x has 2 TCs/chip)
    tiles_per_core = pl.cdiv(total_tiles, ncores)

    # Clamp the block index so a core's surplus tile re-reads a valid tile (its
    # contribution is zeroed by the in-kernel row mask) instead of going fully OOB.
    def x_index_map(c, i):
        return (jnp.minimum(c * tiles_per_core + i, total_tiles - 1), 0)

    kernel = functools.partial(
        _im_tile_kernel, batch=B, tile_b=tile_b, tiles_per_core=tiles_per_core
    )

    cost = pl.CostEstimate(
        flops=6 * B * C,
        transcendentals=2 * B * C,
        bytes_accessed=B * C * itemsize,
    )

    ent_parts, psum_parts = pl.pallas_call(
        kernel,
        out_shape=(
            jax.ShapeDtypeStruct((ncores, 1, 1), jnp.float32),
            jax.ShapeDtypeStruct((ncores, 1, C), jnp.float32),
        ),
        grid_spec=pltpu.PrefetchScalarGridSpec(
            num_scalar_prefetch=0,
            grid=(ncores, tiles_per_core),
            in_specs=[pl.BlockSpec((tile_b, C), x_index_map)],
            out_specs=(
                pl.BlockSpec((1, 1, 1), lambda c, i: (c, 0, 0)),
                pl.BlockSpec((1, 1, C), lambda c, i: (c, 0, 0)),
            ),
        ),
        compiler_params=pltpu.CompilerParams(
            dimension_semantics=("parallel", "arbitrary"),
            vmem_limit_bytes=32 * 1024 * 1024,
        ),
        cost_estimate=cost,
    )(output)

    # Tiny O(cores + C) epilogue: combine per-core partials.  The batch-mean of p is
    # formed from accumulated sums BEFORE the log, so the gent term matches PyTorch.
    loss = jnp.sum(ent_parts) / B
    if gent:
        mp = jnp.sum(psum_parts, axis=(0, 1)) / B  # msoftmax, [C]
        loss = loss - jnp.sum(-mp * jnp.log(mp + 1e-8))
    return loss


def _reference(output: jax.Array, gent: bool = True) -> jax.Array:
    # Pure-JAX reference mirroring the PyTorch module.
    x = output.astype(jnp.float32)
    p = jax.nn.softmax(x, axis=1)
    ent = -jnp.sum(p * jnp.log(p + 1e-5), axis=1)
    loss = jnp.mean(ent)
    if gent:
        mp = jnp.mean(p, axis=0)
        loss = loss - jnp.sum(-mp * jnp.log(mp + 1e-8))
    return loss


if __name__ == "__main__":
    key = jax.random.PRNGKey(0)
    # Non-multiples of (8, 128): exercises partial-tile row masking, the non-128 class
    # axis, and (with tile_b=8) the megacore split with one clamped surplus tile.
    B, C = 34, 40
    x = jax.random.normal(key, (B, C), dtype=jnp.float32)

    for gent in (True, False):
        for tb in (8, None):  # 8 -> multi-tile megacore grid; None -> single auto tile
            loss = jax.block_until_ready(information_maximization(x, gent=gent, tile_b=tb))
            ref = _reference(x, gent=gent)
            assert jnp.allclose(loss, ref, atol=1e-3, rtol=1e-3), (gent, tb, loss, ref)

    print("KERNEL_OK")
</pallas_src>

<mosaic_0001>
module attributes {stable_mosaic.version = 11 : i64} {
  func.func @_im_tile_kernel(%arg0: i32, %arg1: i32, %arg2: memref<8x40xf32, #tpu.memory_space<vmem>>, %arg3: memref<1x1x1xf32, #tpu.memory_space<vmem>>, %arg4: memref<1x1x40xf32, #tpu.memory_space<vmem>>) attributes {dimension_semantics = [#tpu.dimension_semantics<parallel>, #tpu.dimension_semantics<arbitrary>], iteration_bounds = array<i64: 2, 3>, scalar_prefetch = 0 : i64, scratch_operands = 0 : i64, tpu.core_type = #tpu.core_type<tc>, window_params = [{transform_indices = @transform_0, window_bounds = array<i64: 8, 40>}, {transform_indices = @transform_1, window_bounds = array<i64: 1, 1, 1>}, {transform_indices = @transform_2, window_bounds = array<i64: 1, 1, 40>}]} {
    %c0_i32 = arith.constant 0 : i32
    %0 = arith.cmpi eq, %arg1, %c0_i32 : i32
    %1 = arith.extui %0 : i1 to i32
    %c0_i32_0 = arith.constant 0 : i32
    %2 = arith.cmpi ne, %1, %c0_i32_0 : i32
    scf.if %2 {
      %cst_21 = arith.constant 0.000000e+00 : f32
      %52 = vector.broadcast %cst_21 : f32 to vector<1x1x1xf32>
      %c0_22 = arith.constant 0 : index
      %c0_23 = arith.constant 0 : index
      %c0_24 = arith.constant 0 : index
      %53 = vector.load %arg3[%c0_22, %c0_23, %c0_24] : memref<1x1x1xf32, #tpu.memory_space<vmem>>, vector<1x1x1xf32>
      tpu.vector_store %arg3[%c0_22, %c0_23, %c0_24], %52 {strides = array<i32>} : memref<1x1x1xf32, #tpu.memory_space<vmem>>, vector<1x1x1xf32>,
      %cst_25 = arith.constant 0.000000e+00 : f32
      %54 = vector.broadcast %cst_25 : f32 to vector<1x1x40xf32>
      %c0_26 = arith.constant 0 : index
      %c0_27 = arith.constant 0 : index
      %c0_28 = arith.constant 0 : index
      %55 = vector.load %arg4[%c0_26, %c0_27, %c0_28] : memref<1x1x40xf32, #tpu.memory_space<vmem>>, vector<1x1x40xf32>
      tpu.vector_store %arg4[%c0_26, %c0_27, %c0_28], %54 {strides = array<i32>} : memref<1x1x40xf32, #tpu.memory_space<vmem>>, vector<1x1x40xf32>,
    } else {
    }
    %c0 = arith.constant 0 : index
    %c0_1 = arith.constant 0 : index
    %3 = vector.load %arg2[%c0, %c0_1] : memref<8x40xf32, #tpu.memory_space<vmem>>, vector<8x40xf32>
    %c3_i32 = arith.constant 3 : i32
    %4 = arith.muli %arg0, %c3_i32 : i32
    %5 = arith.addi %4, %arg1 : i32
    %c8_i32 = arith.constant 8 : i32
    %6 = arith.muli %5, %c8_i32 : i32
    %7 = tpu.iota {dimensions = array<i32: 0>} : vector<8x1xi32>
    %8 = vector.broadcast %6 : i32 to vector<8x1xi32>
    %9 = arith.addi %8, %7 : vector<8x1xi32>
    %c34_i32 = arith.constant 34 : i32
    %10 = vector.broadcast %c34_i32 : i32 to vector<8x1xi32>
    %11 = arith.cmpi slt, %9, %10 : vector<8x1xi32>
    %cst = arith.constant 0.000000e+00 : f32
    %12 = vector.shape_cast %11 : vector<8x1xi1> to vector<8x1xi1>
    %13 = vector.broadcast %12 : vector<8x1xi1> to vector<8x40xi1>
    %14 = vector.broadcast %cst : f32 to vector<8x40xf32>
    %15 = arith.select %13, %3, %14 : vector<8x40xi1>, vector<8x40xf32>
    %cst_2 = arith.constant dense<0xFF800000> : vector<8xf32>
    %16 = vector.multi_reduction <maximumf>, %15, %cst_2 [1] : vector<8x40xf32> to vector<8xf32>
    %17 = vector.shape_cast %16 : vector<8xf32> to vector<8x1xf32>
    %18 = vector.broadcast %17 : vector<8x1xf32> to vector<8x40xf32>
    %19 = arith.subf %15, %18 : vector<8x40xf32>
    %20 = math.exp %19 : vector<8x40xf32>
    %cst_3 = arith.constant dense<0.000000e+00> : vector<8xf32>
    %21 = vector.multi_reduction <add>, %20, %cst_3 [1] : vector<8x40xf32> to vector<8xf32>
    %22 = vector.shape_cast %21 : vector<8xf32> to vector<8x1xf32>
    %23 = tpu.reciprocal %22 : vector<8x1xf32> -> vector<8x1xf32>
    %24 = vector.broadcast %23 : vector<8x1xf32> to vector<8x40xf32>
    %25 = arith.mulf %20, %24 : vector<8x40xf32>
    %cst_4 = arith.constant 9.99999974E-6 : f32
    %26 = vector.broadcast %cst_4 : f32 to vector<8x40xf32>
    %27 = arith.addf %25, %26 : vector<8x40xf32>
    %28 = math.log %27 : vector<8x40xf32>
    %29 = arith.mulf %25, %28 : vector<8x40xf32>
    %cst_5 = arith.constant dense<0.000000e+00> : vector<8xf32>
    %30 = vector.multi_reduction <add>, %29, %cst_5 [1] : vector<8x40xf32> to vector<8xf32>
    %31 = vector.shape_cast %30 : vector<8xf32> to vector<8x1xf32>
    %cst_6 = arith.constant 0.000000e+00 : f32
    %32 = vector.broadcast %cst_6 : f32 to vector<8x1xf32>
    %33 = arith.subf %32, %31 : vector<8x1xf32>
    %34 = arith.extui %11 : vector<8x1xi1> to vector<8x1xi32>
    %35 = arith.sitofp %34 : vector<8x1xi32> to vector<8x1xf32>
    %c0_7 = arith.constant 0 : index
    %c0_8 = arith.constant 0 : index
    %c0_9 = arith.constant 0 : index
    %36 = vector.load %arg3[%c0_7, %c0_8, %c0_9] : memref<1x1x1xf32, #tpu.memory_space<vmem>>, vector<1x1x1xf32>
    %37 = arith.mulf %33, %35 : vector<8x1xf32>
    %38 = vector.shape_cast %37 : vector<8x1xf32> to vector<1x8x1xf32>
    %cst_10 = arith.constant dense<0.000000e+00> : vector<1xf32>
    %39 = vector.multi_reduction <add>, %38, %cst_10 [1, 2] : vector<1x8x1xf32> to vector<1xf32>
    %40 = vector.shape_cast %39 : vector<1xf32> to vector<1x1x1xf32>
    %41 = vector.extract %40[0, 0, 0] : f32 from vector<1x1x1xf32>
    %42 = vector.broadcast %41 : f32 to vector<1x1x1xf32>
    %43 = arith.addf %36, %42 : vector<1x1x1xf32>
    %c0_11 = arith.constant 0 : index
    %c0_12 = arith.constant 0 : index
    %c0_13 = arith.constant 0 : index
    %44 = vector.load %arg3[%c0_11, %c0_12, %c0_13] : memref<1x1x1xf32, #tpu.memory_space<vmem>>, vector<1x1x1xf32>
    tpu.vector_store %arg3[%c0_11, %c0_12, %c0_13], %43 {strides = array<i32>} : memref<1x1x1xf32, #tpu.memory_space<vmem>>, vector<1x1x1xf32>,
    %c0_14 = arith.constant 0 : index
    %c0_15 = arith.constant 0 : index
    %c0_16 = arith.constant 0 : index
    %45 = vector.load %arg4[%c0_14, %c0_15, %c0_16] : memref<1x1x40xf32, #tpu.memory_space<vmem>>, vector<1x1x40xf32>
    %46 = vector.broadcast %35 : vector<8x1xf32> to vector<8x40xf32>
    %47 = arith.mulf %25, %46 : vector<8x40xf32>
    %cst_17 = arith.constant dense<0.000000e+00> : vector<40xf32>
    %48 = vector.multi_reduction <add>, %47, %cst_17 [0] : vector<8x40xf32> to vector<40xf32>
    %49 = vector.shape_cast %48 : vector<40xf32> to vector<1x1x40xf32>
    %50 = arith.addf %45, %49 : vector<1x1x40xf32>
    %c0_18 = arith.constant 0 : index
    %c0_19 = arith.constant 0 : index
    %c0_20 = arith.constant 0 : index
    %51 = vector.load %arg4[%c0_18, %c0_19, %c0_20] : memref<1x1x40xf32, #tpu.memory_space<vmem>>, vector<1x1x40xf32>
    tpu.vector_store %arg4[%c0_18, %c0_19, %c0_20], %50 {strides = array<i32>} : memref<1x1x40xf32, #tpu.memory_space<vmem>>, vector<1x1x40xf32>,
    return
  }
  func.func @transform_0(%arg0: i32, %arg1: i32) -> (i32, i32) {
    %c3_i32 = arith.constant 3 : i32
    %0 = arith.muli %arg0, %c3_i32 : i32
    %1 = arith.addi %0, %arg1 : i32
    %c4_i32 = arith.constant 4 : i32
    %2 = arith.minsi %1, %c4_i32 : i32
    %c0_i32 = arith.constant 0 : i32
    %c0_i32_0 = arith.constant 0 : i32
    return %2, %c0_i32 : i32, i32
  }
  func.func @transform_1(%arg0: i32, %arg1: i32) -> (i32, i32, i32) {
    %c0_i32 = arith.constant 0 : i32
    %c0_i32_0 = arith.constant 0 : i32
    %c0_i32_1 = arith.constant 0 : i32
    return %arg0, %c0_i32, %c0_i32_0 : i32, i32, i32
  }
  func.func @transform_2(%arg0: i32, %arg1: i32) -> (i32, i32, i32) {
    %c0_i32 = arith.constant 0 : i32
    %c0_i32_0 = arith.constant 0 : i32
    %c0_i32_1 = arith.constant 0 : i32
    return %arg0, %c0_i32, %c0_i32_0 : i32, i32, i32
  }
}

</mosaic_0001>

<bundles_post_ra>
// kernel: tpu_custom_call.1
= control target key start
LH: loop header
LB: loop body
LE: loop exit
PB: predicated region body
PF: predicated region fallthrough
CT: control target
= control target key end

     0   :  { %8 = vsyncpa [#allocation3], 0  ;;  %s925_s0 = inlined_call_operand.hbm [shape: f32[34,40], index: 0, kind: input, shape index: {}]   ;;  %s926_s1 = inlined_call_operand.vmem [shape: f32[2,1,1], index: 1, kind: output, shape index: {0}]   ;;  %s927_s2 = inlined_call_operand.hbm [shape: f32[2,1,40], index: 2, kind: output, shape index: {1}]  }
   0x1   :  { %10 = vsyncpa [#allocation3 + $0x1], 0 }
   0x2   :  { %11 = vsyncpa [#allocation4], 0 }
   0x3   :  { %13 = vsyncpa [#allocation4 + $0x1], 0  ;;  %s679_s9 = smov 0   ;;  %s681_s10 = smov 0  }
   0x4   :  { %s683_s11 = smov 0   ;;  %s685_s12 = smov 0  }
   0x5   :  { %s687_s13 = smov 0   ;;  %s689_s14 = smov 0  }
   0x6   :  { %s691_s15 = smov 0   ;;  %s693_s16 = smov 0  }
   0x7   :  { %s695_s17 = smov 0   ;;  %s697_s18 = smov 0  }
   0x8   :  { %s699_s19 = smov 0  }
   0x9 LB: > { %s380_s20 = sadd.s32 4294967295, %s658_s19   ;;  %s381_s21 = sadd.s32 4294967294, %s658_s19   ;;  %s658_s19 = sphi %s699_s19, %s19_s19   ;;  %s654_s18 = sphi %s697_s18, %s947_s18   ;;  %s650_s17 = sphi %s695_s17, %s946_s17   ;;  %s646_s16 = sphi %s693_s16, %s945_s16   ;;  %s642_s15 = sphi %s691_s15, %s944_s15   ;;  %s638_s14 = sphi %s689_s14, %s943_s14   ;;  %s634_s13 = sphi %s687_s13, %s942_s13   ;;  %s630_s12 = sphi %s685_s12, %s941_s12   ;;  %s626_s11 = sphi %s683_s11, %s940_s11   ;;  %s622_s10 = sphi %s681_s10, %s939_s10   ;;  %s618_s9 = sphi %s679_s9, %s938_s9  }
   0xa   : > { %s28_s22 = sadd.s32 1, %s650_s17  ;;  %s31_s23 = sadd.s32 1, %s654_s18 }
   0xb   : > { %p29_p0 = scmp.ge.s32.totalorder %s28_s22, 3  ;;  %s35_s24 = smul.u32 3, %s654_s18 }
   0xc   : > { %s46_s25 = sadd.s32 1, %s638_s14  ;;  %p53_p1 = scmp.ne.s32.totalorder %s638_s14, %s634_s13 }
   0xd   : > { %s949_s22 = smov (%p29_p0, %s28_s22), 0  ;;  %s951_s23 = smov (!%p29_p0, %s31_s23), %s654_s18 }
   0xe   : > { %s36_s26 = sadd.s32 %s650_s17, %s35_s24  ;;  %p54_p2 = scmp.eq.s32.totalorder %s658_s19, 0 }
   0xf   : > { %p33_p3 = scmp.ge.s32.totalorder %s951_s23, 2  ;;  %p37_p4 = scmp.lt.s32.totalorder %s36_s26, 4 }
  0x10   : > { %p747_p5 = por %p54_p2, %p53_p1  ;;  %p59_p6 = scmp.ne.s32.totalorder %s634_s13, %s630_s12 }
  0x11   : > { %s953_s23 = smov (%p33_p3, %s951_s23), 0  ;;  %s955_s26 = smov (!%p37_p4, %s36_s26), 4 }
  0x12   : > { %s39_s28 = smul.u32 3, %s953_s23  ;;  %p60_p7 = scmp.eq.s32.totalorder %s380_s20, 0 }
  0x13   : > { %s95_s29 = ssub.s32 %s654_s18, %s953_s23  ;;  %s98_s30 = sadd.s32 1, %s626_s11 }
  0x14   : > { %s40_s3 = sadd.s32 %s39_s28, %s949_s22  ;;  %p760_p8 = por %p60_p7, %p59_p6 }
  0x15   : > { %p41_p9 = scmp.lt.s32.totalorder %s40_s3, 4  ;;  %p96_p10 = scmp.eq.s32.totalorder %s95_s29, 0 }
  0x16   : > { %p108_p11 = scmp.ne.s32.totalorder %s626_s11, %s622_s10  ;;  %p109_p12 = scmp.eq.s32.totalorder %s380_s20, 5 }
  0x17   : > { %s957_s3 = smov (!%p41_p9, %s40_s3), 4  ;;  %p114_p1 = scmp.ne.s32.totalorder %s622_s10, %s618_s9 }
  0x18   : > { %s767_s5 = scalar_select %p96_p10, %s626_s11, %s98_s30  }
  0x19   : > { %s43_s6 = ssub.s32 %s955_s26, %s957_s3  ;;  %p769_p13 = por %p109_p12, %p108_p11 }
  0x1a   : > { %p44_p0 = scmp.eq.s32.totalorder %s43_s6, 0  ;;  %p115_p2 = scmp.eq.s32.totalorder %s381_s21, 5 }
  0x1b   : > { %s931_s7 = scalar_select %p769_p13, 1, 0 }
  0x1c   : > { %s780_s8 = scalar_select %p44_p0, %s638_s14, %s46_s25  }
  0x1d   : > { %p782_p3 = por %p115_p2, %p114_p1  ;;  %p408_p4 = scmp.lt.s32.totalorder %s658_s19, 6 }
  0x1e   : > { %s135_s20 = sand.u32 1, %s638_s14   ;;  %s385_s24 = sshll.u32 %s955_s26, 7 }
  0x1f   : > { %s932_s12 = scalar_select %p782_p3, 1, 0 }
  0x20   : > { %s384_s28 = sshll.u32 %s135_s20, 3  ;;  %s791_s3 = scalar_lea.hbm %s925_s0, %s385_s24 }
  0x21   : > { %s139_s21 = scalar_lea.vmem [#allocation2], %s384_s28  ;;  %p795_p6 = pnand %p408_p4, %p747_p5 }
  0x22   : > { %s150_s25 = sshll.u32 %s139_s21, 4  ;;  %s136_s26 = scalar_lea.sflag [#allocation3], %s135_s20  ;;  %s799_s25 = int_to_ptr.vmem [resolvable:$true] %s150_s25 }
  0x23   : > { %s506_s24 = scalar_lea.hbm %s791_s3, 128  ;;  %p508_p11 = pneg %p795_p6 }
  0x24   : > { %p507_p10 = scmp.ne.s32.totalorder %s791_s3, %s506_s24  ;;  %s511_s29 = scalar_lea.hbm %s925_s0, 640 }
  0x25   : > { %p512_p5 = scmp.lt.u32.totalorder %s791_s3, %s925_s0  ;;  %p513_p1 = scmp.lt.u32.totalorder %s511_s29, %s506_s24 }
  0x26   : > { %p509_p12 = pnand %p508_p11, %p507_p10  ;;  %p515_p4 = scmp.lt.u32.totalorder %s506_s24, %s791_s3 }
  0x27   : > { %p514_p2 = por %p513_p1, %p512_p5 }
  0x28   : > { %p510_p0 = pneg %p509_p12 }
  0x29   : > { %p516_p7 = por %p515_p4, %p514_p2 }
  0x2b   : > { %p517_p9 = pnand %p516_p7, %p510_p0 }
  0x2d   : > { %520 = shalt.err (!%p517_p9)
}
  0x2e   : > { %s521_s20 = scalar_lea.vmem %s799_s25, 128  ;;  %s660_s27 = smov [#allocation2]  }
  0x2f   : > { %p522_p10 = scmp.ne.s32.totalorder %s799_s25, %s521_s20  ;;  %s526_s28 = sshll.u32 %s660_s27, 4  ;;  %s527_s28 = int_to_ptr.vmem [resolvable:$false] %s526_s28 }
  0x30   : > { %s528_s30 = scalar_lea.vmem %s527_s28, 256  ;;  %p529_p13 = scmp.lt.s32.totalorder %s799_s25, %s527_s28 }
  0x31   : > { %p524_p12 = pnand %p522_p10, %p508_p11  ;;  %p530_p5 = scmp.lt.s32.totalorder %s528_s30, %s521_s20 }
  0x33   : > { %p525_p3 = pneg %p524_p12  ;;  %p531_p1 = por %p530_p5, %p529_p13 }
  0x35   : > { %p532_p2 = pnand %p531_p1, %p525_p3 }
  0x37   : > { %535 = shalt.err (!%p532_p2)
}
  0x38   : > { %403 = dma.hbm_to_vmem [thread:$0]  (!%p795_p6), %s791_s3, 128, %s799_s25, %s136_s26  }
  0x39   : > { %p934_p7 = scmp.lt.s32.totalorder %s658_s19, 7  ;;  %p935_p9 = scmp.ge.s32.totalorder %s658_s19, 1 }
  0x3b   : > { %p156_p11 = pnand %p935_p9, %p934_p7 }
  0x3c   : > { %s161_s24 = sand.u32 (!%p156_p11), 1, %s634_s13  }
  0x3d   : > { %159 = sbr.rel (%p156_p11) target bundleno = 775 (0x307), region = 24  ;;  %s387_s29 = sshll.u32 (!%p156_p11), %s161_s24, 3 }
  0x3e   : > { %s162_s21 = scalar_lea.sflag (!%p156_p11), [#allocation3], %s161_s24  ;;  %s165_s20 = scalar_lea.vmem (!%p156_p11), [#allocation2], %s387_s29 }
  0x44   : > { %609 = dma.done.wait (%p760_p8), %s162_s21, 128  }
  0x45   : > { %611 = vsyncadd (%p760_p8), %s162_s21, 4294967168  ;;  %s186_s3 = sand.u32 1, %s622_s10   ;;  %p192_p13 = scmp.lt.s32.totalorder %s646_s16, 1 }
  0x46   : > { %s847_s28 = scalar_lea.vmem [#allocation5], %s186_s3  ;;  %p388_p3 = scmp.ne.s32.totalorder %s642_s15, 0 }
  0x47   : > { %s193_s25 = scalar_select %p192_p13, %s646_s16, 1 }
  0x48   : > { %198 = sbr.rel (%p388_p3) target bundleno = 79 (0x4f), region = 32  ;;  %vm199_vm0 = vcmask (!%p388_p3), 0   ;;  %vm201_vm1 = vcmask (!%p388_p3), 319488   ;;  %v661_v0 = vmov (!%p388_p3), 0.0  }
  0x49   : > { %s843_s27 = scalar_lea.vmem %s926_s1, %s193_s25  ;;  %202 = vst.msk [vmem:[%s847_s28] sm:$0x1] (!%p388_p3), %vm201_vm1, %v661_v0 }
  0x4a   : > { %200 = vst.msk [vmem:[%s843_s27] sm:$0x1] (!%p388_p3), %vm199_vm0, %v661_v0 }
  0x4f PF: > { %s204_s4 = smul.u32 3, %s646_s16  ;;  %v207_v1 = vlaneseq  ;;  %v203_v4 = vld [vmem:[%s165_s20] sm:$0xff]  ;;  %vm215_vm2 = vcmask 326656   ;;  %v662_v15 = vmov 0.0   ;;  %vm263_vm4 = vcmask 319488   ;;  %s284_s29 = sshll.u32 %s847_s28, 4  ;;  %s285_s29 = int_to_ptr.vmem [resolvable:$true] %s284_s29 }
  0x50   : > { %v253_v27 = vld [vmem:[%s847_s28] sm:$0x1]  ;;  %vm238_vm5 = vcmask 7168   ;;  %s269_s6 = scalar_lea.sflag [#allocation4], %s186_s3  ;;  %s536_s26 = scalar_lea.vmem %s285_s29, 16 }
  0x51   : > { %s205_s30 = sadd.s32 %s642_s15, %s204_s4  ;;  %v208_v2 = vshrl.u32 %v207_v1, 7  ;;  %s391_s15 = sshll.u32 %s646_s16, 4 }
  0x52   : > { %s389_s24 = sshll.u32 %s205_s30, 3  ;;  %s865_s25 = scalar_lea.hbm %s927_s2, %s391_s15 }
  0x53   : > { %v209_v3 = vstv %s389_s24  ;;  %p537_p8 = scmp.ne.s32.totalorder %s285_s29, %s536_s26  ;;  %p936_p6 = scmp.ne.s32.totalorder %s931_s7, 0 }
  0x54   : > { %v210_v5 = vadd.s32 %v209_v3, %v208_v2  ;;  %s663_s4 = smov [#allocation5]  }
  0x55   : > { %p538_p0 = pnand %p537_p8, %p936_p6  ;;  %s540_s30 = sshll.u32 %s663_s4, 4  ;;  %s541_s30 = int_to_ptr.vmem [resolvable:$false] %s540_s30 }
  0x56   : > { %vm211_vm3 = vcmp.lt.s32.totalorder %v210_v5, 34  ;;  %s542_s24 = scalar_lea.vmem %s541_s30, 32  ;;  %p543_p10 = scmp.lt.s32.totalorder %s285_s29, %s541_s30 }
  0x57   : > { %v214_v6 = vsel %vm211_vm3, %v203_v4, 0.0  ;;  %v390_v16 = vsel %vm211_vm3, 1.0, %v662_v15  ;;  %p539_p4 = pneg %p538_p0  ;;  %p544_p12 = scmp.lt.s32.totalorder %s542_s24, %s536_s26 }
  0x58   : > { %v216_v7 = vsel %vm215_vm2, %v214_v6, -inf }
  0x59   : > { %217 = vmax.xlane.f32.xlu0 %v216_v7  ;;  %p545_p5 = por %p544_p12, %p543_p10 }
  0x5b   : > { %p546_p1 = pnand %p545_p5, %p539_p4 }
  0xe6   : > { %v218_v8 = vpop.xlane.xlu0 %217 }
  0xe7   : > { %v219_v9 = vsub.f32 %v214_v6, %v218_v8 }
  0xe9   : > { %v220_v10 = vmul.f32 1.442695, %v219_v9 }
  0xeb   : > { %500 = vpow2.f32 %v220_v10 }
  0xf5   : > { %v501_v11 = vpop.eup %500 }
  0xf6   : > { %v222_v12 = vsel %vm215_vm2, %v501_v11, 0.0 }
  0xf7   : > { %223 = vadd.xlane.f32.xlu0 %v222_v12 }
 0x184   : > { %v224_v13 = vpop.xlane.xlu0 %223 }
 0x185   : > { %502 = vrcp.f32 %v224_v13 }
 0x18f   : > { %v503_v14 = vpop.eup %502 }
 0x190   : > { %v226_v17 = vmul.f32 %v503_v14, %v501_v11 }
 0x192   : > { %v227_v18 = vadd.f32 1e-05, %v226_v17  ;;  %v254_v19 = vmul.f32 %v390_v16, %v226_v17 }
 0x194   : > { %504 = vlog2.f32 %v227_v18  ;;  %v255_v20 = vsel %vm215_vm2, %v254_v19, 0.0 }
 0x195   : > { %v256_v21 = vrot.slane %v255_v20, 4 }
 0x197   : > { %v257_v22 = vadd.f32 %v256_v21, %v255_v20 }
 0x199   : > { %v258_v23 = vrot.slane %v257_v22, 2 }
 0x19b   : > { %v259_v24 = vadd.f32 %v258_v23, %v257_v22 }
 0x19d   : > { %v260_v25 = vrot.slane %v259_v24, 1 }
 0x19e   : > { %v505_v26 = vpop.eup %504 }
 0x19f   : > { %v229_v28 = vmul.f32 0.6931472, %v505_v26  ;;  %v261_v29 = vadd.f32 %v260_v25, %v259_v24 }
 0x1a1   : > { %v230_v30 = vmul.f32 %v229_v28, %v226_v17  ;;  %v262_v31 = vadd.f32 %v261_v29, %v253_v27 }
 0x1a3   : > { %v231_v32 = vsel %vm215_vm2, %v230_v30, 0.0  ;;  %264 = vst.msk [vmem:[%s847_s28] sm:$0x1] %vm263_vm4, %v262_v31 }
 0x1a4   : > { %232 = vadd.xlane.f32.xlu1 %v231_v32 }
 0x231   : > { %v233_v33 = vpop.xlane.xlu1 %232 }
 0x232   : > { %v234_v34 = vsub.f32 0.0, %v233_v33 }
 0x234   : > { %v237_v35 = vmul.f32 %v390_v16, %v234_v34 }
 0x236   : > { %v239_v36 = vsel %vm238_vm5, %v237_v35, 0.0 }
 0x237   : > { %240 = vadd.xlane.f32.xlu1 %v239_v36 }
 0x238   : > { %549 = shalt.err (!%p546_p1)
}
 0x239   : > { %s550_s16 = scalar_lea.hbm %s865_s25, 16  ;;  %s554_s15 = scalar_lea.hbm %s927_s2, 32 }
 0x23a   : > { %p551_p2 = scmp.ne.s32.totalorder %s865_s25, %s550_s16  ;;  %p555_p11 = scmp.lt.u32.totalorder %s865_s25, %s927_s2 }
 0x23b   : > { %p556_p13 = scmp.lt.u32.totalorder %s554_s15, %s550_s16  ;;  %p558_p8 = scmp.lt.u32.totalorder %s550_s16, %s865_s25 }
 0x23c   : > { %p552_p7 = pnand %p551_p2, %p936_p6 }
 0x23d   : > { %p557_p3 = por %p556_p13, %p555_p11 }
 0x23e   : > { %p553_p9 = pneg %p552_p7 }
 0x23f   : > { %p559_p0 = por %p558_p8, %p557_p3 }
 0x241   : > { %p560_p4 = pnand %p559_p0, %p553_p9 }
 0x243   : > { %563 = shalt.err (!%p560_p4)
}
 0x244   : > { %398 = dma.vmem_to_hbm [thread:$0]  (%p936_p6), %s285_s29, 16, %s865_s25, %s269_s6   ;;  %v236_v44 = vld [vmem:[%s843_s27] sm:$0x1]  ;;  %vm251_vm6 = vcmask 0  }
 0x2c4   : > { %v241_v37 = vpop.xlane.xlu1 %240 }
 0x2c5   : > { %v242_v38 = vrot.slane %v241_v37, 4 }
 0x2c7   : > { %v243_v39 = vadd.f32 %v242_v38, %v241_v37 }
 0x2c9   : > { %v244_v40 = vrot.slane %v243_v39, 2 }
 0x2cb   : > { %v245_v41 = vadd.f32 %v244_v40, %v243_v39 }
 0x2cd   : > { %v246_v42 = vrot.slane %v245_v41, 1 }
 0x2cf   : > { %v247_v43 = vadd.f32 %v246_v42, %v245_v41 }
 0x2d1   : > { %394 = vpush %v247_v43 }
 0x302   : > { %s395_s26 = spop %394 }
 0x303   : > { %v249_v45 = vstv %s395_s26 }
 0x304   : > { %v250_v46 = vadd.f32 %v249_v45, %v236_v44 }
 0x306   : > { %252 = vst.msk [vmem:[%s843_s27] sm:$0x1] %vm251_vm6, %v250_v46 }
 0x307 PF: > { %p409_p10 = scmp.ge.s32.totalorder %s658_s19, 2  ;;  %s302_s7 = sand.u32 1, %s618_s9  }
 0x308   : > { %p937_p6 = scmp.ne.s32.totalorder %s932_s12, 0  ;;  %s303_s29 = scalar_lea.sflag [#allocation4], %s302_s7 }
 0x30a   : > { %p405_p12 = pnand %p409_p10, %p937_p6 }
 0x30c   : > { %613 = dma.done.wait (!%p405_p12), %s303_s29, 16  }
 0x30d   : > { %615 = vsyncadd (!%p405_p12), %s303_s29, 4294967280  ;;  %s19_s19 = sadd.s32 1, %s658_s19   ;;  %s938_s9 = smov %s622_s10 }
 0x30e   : > { %p16_p5 = scmp.ge.s32.totalorder %s19_s19, 8   ;;  %s939_s10 = smov %s626_s11 }
 0x30f   : > { %s940_s11 = smov %s767_s5  ;;  %s941_s12 = smov %s634_s13 }
 0x310   : > { %s942_s13 = smov %s638_s14  ;;  %s943_s14 = smov %s780_s8 }
 0x311   : > { %s944_s15 = smov %s650_s17  ;;  %s945_s16 = smov %s654_s18 }
 0x312   : > { %s946_s17 = smov %s949_s22  ;;  %s947_s18 = smov %s953_s23 }
 0x313   :  { %18 = sbr.rel (!%p16_p5) target bundleno = 9 (0x9), region = 85 }
 0x31a   :  { %307 = vsyncpa [#allocation3], 1 }
 0x31b   :  { %309 = vsyncpa [#allocation3 + $0x1], 1 }
 0x31c   :  { %310 = vsyncpa [#allocation4], 1 }
 0x31d   :  { %312 = vsyncpa [#allocation4 + $0x1], 1 }

</bundles_post_ra>
